<compile_context>
chip_gen: v5e
topology: v5e:2x2
jax: 0.10.0
libtpu: 0.0.40
codegen_flags: <defaults>
</compile_context>

<pallas_src>
import jax
import jax.numpy as jnp
from jax.experimental import pallas as pl
from jax.experimental.pallas import tpu as pltpu


def _mlp_kernel(x_ref, w1_ref, b1_ref, w2_ref, b2_ref, w3_ref, b3_ref, o_ref):
    # x_ref: (tb, 63) f32, cast to bf16 in-kernel (VPU) -> MXU input.
    x = x_ref[...].astype(jnp.bfloat16)

    # fc1: (tb, 63) @ (63, 128) -> f32 acc; bias add in f32; ReLU fused with
    # the bf16 downcast that fc2's MXU pass needs (relu commutes with the cast).
    h1 = jnp.dot(x, w1_ref[...], preferred_element_type=jnp.float32)
    h1 = jnp.maximum((h1 + b1_ref[...]).astype(jnp.bfloat16), 0.0)

    # fc2: (tb, 128) @ (128, 32) -> f32; bias + ReLU stay f32 (feeds the VPU fc3).
    h2 = jnp.dot(h1, w2_ref[...], preferred_element_type=jnp.float32)
    h2 = jnp.maximum(h2 + b2_ref[...], 0.0)

    # fc3 (32 -> 1): degenerate matmul moved off the MXU -> VPU multiply +
    # cross-lane reduce (XLU).  Avoids a stationary-weight load + MRF pop and
    # the (tb, 32) bf16 cast per tile.
    out = jnp.sum(h2 * w3_ref[...], axis=-1, keepdims=True) + b3_ref[...]
    o_ref[...] = out.astype(o_ref.dtype)


def hand_gesture_forward(x, params, *, tb_max=8192):
    """x: (B, 63) float32.  params in PyTorch layout:
       w1 (128,63), b1 (128,), w2 (32,128), b2 (32,), w3 (1,32), b3 (1,).
       Returns (B, 1) float32, matching HandGestureModel.forward."""
    B, K = x.shape
    assert K == 63

    # ---- batch tile selection -------------------------------------------
    # Tiny batches: one full-array block (always a legal block shape).
    # Larger batches: 128-aligned tile, capped at tb_max, and never larger
    # than ~B/2 so there are >= 2 grid steps (megacore on v7x).  The last
    # (ragged) tile is handled by Pallas OOB semantics.
    if B <= 256:
        tb = B
    else:
        tb = min(int(tb_max) // 128 * 128, ((B + 255) // 256) * 128)
        tb = max(tb, 128)
    n_tiles = pl.cdiv(B, tb)

    # ---- weights / biases (tiny, one-time prep; not on the streaming path) --
    bf = jnp.bfloat16
    w1t = jnp.asarray(params["w1"], jnp.float32).T.astype(bf)     # (63, 128)
    w2t = jnp.asarray(params["w2"], jnp.float32).T.astype(bf)     # (128, 32)
    w3 = jnp.asarray(params["w3"], jnp.float32).reshape(1, 32)    # f32 (VPU fc3)
    b1 = jnp.asarray(params["b1"], jnp.float32).reshape(1, 128)
    b2 = jnp.asarray(params["b2"], jnp.float32).reshape(1, 32)
    b3 = jnp.asarray(params["b3"], jnp.float32).reshape(1, 1)

    const = lambda shape: pl.BlockSpec(shape, lambda i: (0, 0))   # VMEM-resident

    # ~4 KiB of live VMEM per batch row at the chosen tile (x f32 2-buf
    # lane-padded, h1 f32 + bf16, h2 f32, out 2-buf) plus headroom for Mosaic
    # scratch.  For tb=8192 this is ~40 MiB -- fits the 64 MiB v7x VMEM.
    vmem_limit = int(min(tb * 4096 + (8 << 20), 100 << 20))

    cost = pl.CostEstimate(
        flops=2 * B * (63 * 128 + 128 * 32 + 32 * 1),
        transcendentals=0,
        bytes_accessed=x.size * 4 + B * 4
        + (w1t.size + w2t.size) * 2
        + (w3.size + b1.size + b2.size + b3.size) * 4,
    )

    out = pl.pallas_call(
        _mlp_kernel,
        out_shape=jax.ShapeDtypeStruct((B, 1), jnp.float32),
        grid=(n_tiles,),
        in_specs=[
            pl.BlockSpec((tb, 63), lambda i: (i, 0)),   # x: streamed batch tiles
            const((63, 128)),                           # w1^T  (bf16)
            const((1, 128)),                            # b1    (f32)
            const((128, 32)),                           # w2^T  (bf16)
            const((1, 32)),                             # b2    (f32)
            const((1, 32)),                             # w3    (f32, VPU)
            const((1, 1)),                              # b3    (f32)
        ],
        out_specs=pl.BlockSpec((tb, 1), lambda i: (i, 0)),
        compiler_params=pltpu.CompilerParams(
            dimension_semantics=("parallel",),          # batch tiles across TCs
            vmem_limit_bytes=vmem_limit,
        ),
        cost_estimate=cost,
    )(x, w1t, b1, w2t, b2, w3, b3)

    return out  # (B, 1)

    # TODO(synk): optional fp8 (e4m3) x/w1/w2 path gated on v7x via
    # pltpu.get_tpu_info(); skipped to keep one numerics path for all chips.


def init_params(key):
    """PyTorch nn.Linear default init, weights stored in PyTorch (out, in) layout."""
    dims = [(63, 128), (128, 32), (32, 1)]
    params = {}
    for i, (fan_in, fan_out) in enumerate(dims, start=1):
        key, kw, kb = jax.random.split(key, 3)
        bound = 1.0 / jnp.sqrt(jnp.float32(fan_in))
        params[f"w{i}"] = jax.random.uniform(
            kw, (fan_out, fan_in), jnp.float32, -bound, bound
        )
        params[f"b{i}"] = jax.random.uniform(
            kb, (fan_out,), jnp.float32, -bound, bound
        )
    return params


def reference_forward(x, params):
    """Reference with the same bf16-input / f32-accumulation casts as the kernel."""
    bf = jnp.bfloat16
    h = jnp.dot(x.astype(bf), params["w1"].T.astype(bf),
                preferred_element_type=jnp.float32) + params["b1"]
    h = jnp.maximum(h.astype(bf), 0.0)
    h = jnp.dot(h, params["w2"].T.astype(bf),
                preferred_element_type=jnp.float32) + params["b2"]
    h = jnp.maximum(h, 0.0)
    out = jnp.sum(h * params["w3"].reshape(1, 32), axis=-1, keepdims=True) \
        + params["b3"]
    return out


if __name__ == "__main__":
    key = jax.random.PRNGKey(0)
    key, kx1, kx2 = jax.random.split(key, 3)
    params = init_params(key)

    # Small single-tile case (B = 8).
    B1 = 8
    x1 = jax.random.normal(kx1, (B1, 63), jnp.float32)
    out1 = jax.block_until_ready(hand_gesture_forward(x1, params))
    ref1 = reference_forward(x1, params)
    assert out1.shape == (B1, 1), out1.shape
    assert jnp.allclose(out1, ref1, atol=5e-3, rtol=5e-3), (
        float(jnp.max(jnp.abs(out1 - ref1)))
    )

    # Multi-tile case with a ragged last tile (B = 300 -> tiles of 256).
    B2 = 300
    x2 = jax.random.normal(kx2, (B2, 63), jnp.float32)
    out2 = jax.block_until_ready(hand_gesture_forward(x2, params))
    ref2 = reference_forward(x2, params)
    assert out2.shape == (B2, 1), out2.shape
    assert jnp.allclose(out2, ref2, atol=5e-3, rtol=5e-3), (
        float(jnp.max(jnp.abs(out2 - ref2)))
    )

    print("KERNEL_OK")
</pallas_src>

<mosaic_0001>
module attributes {stable_mosaic.version = 11 : i64} {
  func.func @_mlp_kernel(%arg0: i32, %arg1: memref<8x63xf32, #tpu.memory_space<vmem>>, %arg2: memref<63x128xbf16, #tpu.memory_space<vmem>>, %arg3: memref<1x128xf32, #tpu.memory_space<vmem>>, %arg4: memref<128x32xbf16, #tpu.memory_space<vmem>>, %arg5: memref<1x32xf32, #tpu.memory_space<vmem>>, %arg6: memref<1x32xf32, #tpu.memory_space<vmem>>, %arg7: memref<1x1xf32, #tpu.memory_space<vmem>>, %arg8: memref<8x1xf32, #tpu.memory_space<vmem>>) attributes {dimension_semantics = [#tpu.dimension_semantics<parallel>], iteration_bounds = array<i64: 1>, scalar_prefetch = 0 : i64, scratch_operands = 0 : i64, tpu.core_type = #tpu.core_type<tc>, window_params = [{transform_indices = @transform_0, window_bounds = array<i64: 8, 63>}, {pipeline_mode = #tpu.pipeline_mode<synchronous>, transform_indices = @transform_1, window_bounds = array<i64: 63, 128>}, {pipeline_mode = #tpu.pipeline_mode<synchronous>, transform_indices = @transform_2, window_bounds = array<i64: 1, 128>}, {pipeline_mode = #tpu.pipeline_mode<synchronous>, transform_indices = @transform_3, window_bounds = array<i64: 128, 32>}, {pipeline_mode = #tpu.pipeline_mode<synchronous>, transform_indices = @transform_4, window_bounds = array<i64: 1, 32>}, {pipeline_mode = #tpu.pipeline_mode<synchronous>, transform_indices = @transform_5, window_bounds = array<i64: 1, 32>}, {pipeline_mode = #tpu.pipeline_mode<synchronous>, transform_indices = @transform_6, window_bounds = array<i64: 1, 1>}, {transform_indices = @transform_7, window_bounds = array<i64: 8, 1>}]} {
    %c0 = arith.constant 0 : index
    %c0_0 = arith.constant 0 : index
    %0 = vector.load %arg1[%c0, %c0_0] : memref<8x63xf32, #tpu.memory_space<vmem>>, vector<8x63xf32>
    %1 = arith.truncf %0 : vector<8x63xf32> to vector<8x63xbf16>
    %c0_1 = arith.constant 0 : index
    %c0_2 = arith.constant 0 : index
    %2 = vector.load %arg2[%c0_1, %c0_2] : memref<63x128xbf16, #tpu.memory_space<vmem>>, vector<63x128xbf16>
    %cst = arith.constant dense<0.000000e+00> : vector<8x128xf32>
    %3 = tpu.matmul %1, %2, %cst {dimension_numbers = #tpu.dot_dimension_numbers<[1], [0], [0], [1], [0, 0, 1, 1], [], []>} : vector<8x63xbf16>, vector<63x128xbf16>, vector<8x128xf32> -> vector<8x128xf32>
    %c0_3 = arith.constant 0 : index
    %c0_4 = arith.constant 0 : index
    %4 = vector.load %arg3[%c0_3, %c0_4] : memref<1x128xf32, #tpu.memory_space<vmem>>, vector<1x128xf32>
    %5 = vector.broadcast %4 : vector<1x128xf32> to vector<8x128xf32>
    %6 = arith.addf %3, %5 : vector<8x128xf32>
    %7 = arith.truncf %6 : vector<8x128xf32> to vector<8x128xbf16>
    %cst_5 = arith.constant 0.000000e+00 : bf16
    %8 = vector.broadcast %cst_5 : bf16 to vector<8x128xbf16>
    %9 = arith.maximumf %7, %8 : vector<8x128xbf16>
    %c0_6 = arith.constant 0 : index
    %c0_7 = arith.constant 0 : index
    %10 = vector.load %arg4[%c0_6, %c0_7] : memref<128x32xbf16, #tpu.memory_space<vmem>>, vector<128x32xbf16>
    %cst_8 = arith.constant dense<0.000000e+00> : vector<8x32xf32>
    %11 = tpu.matmul %9, %10, %cst_8 {dimension_numbers = #tpu.dot_dimension_numbers<[1], [0], [0], [1], [0, 0, 1, 1], [], []>} : vector<8x128xbf16>, vector<128x32xbf16>, vector<8x32xf32> -> vector<8x32xf32>
    %c0_9 = arith.constant 0 : index
    %c0_10 = arith.constant 0 : index
    %12 = vector.load %arg5[%c0_9, %c0_10] : memref<1x32xf32, #tpu.memory_space<vmem>>, vector<1x32xf32>
    %13 = vector.broadcast %12 : vector<1x32xf32> to vector<8x32xf32>
    %14 = arith.addf %11, %13 : vector<8x32xf32>
    %cst_11 = arith.constant 0.000000e+00 : f32
    %15 = vector.broadcast %cst_11 : f32 to vector<8x32xf32>
    %16 = arith.maximumf %14, %15 : vector<8x32xf32>
    %c0_12 = arith.constant 0 : index
    %c0_13 = arith.constant 0 : index
    %17 = vector.load %arg6[%c0_12, %c0_13] : memref<1x32xf32, #tpu.memory_space<vmem>>, vector<1x32xf32>
    %18 = vector.broadcast %17 : vector<1x32xf32> to vector<8x32xf32>
    %19 = arith.mulf %16, %18 : vector<8x32xf32>
    %cst_14 = arith.constant dense<0.000000e+00> : vector<8xf32>
    %20 = vector.multi_reduction <add>, %19, %cst_14 [1] : vector<8x32xf32> to vector<8xf32>
    %21 = vector.shape_cast %20 : vector<8xf32> to vector<8x1xf32>
    %c0_15 = arith.constant 0 : index
    %c0_16 = arith.constant 0 : index
    %22 = vector.load %arg7[%c0_15, %c0_16] : memref<1x1xf32, #tpu.memory_space<vmem>>, vector<1x1xf32>
    %23 = vector.broadcast %22 : vector<1x1xf32> to vector<8x1xf32>
    %24 = arith.addf %21, %23 : vector<8x1xf32>
    %c0_17 = arith.constant 0 : index
    %c0_18 = arith.constant 0 : index
    %25 = vector.load %arg8[%c0_17, %c0_18] : memref<8x1xf32, #tpu.memory_space<vmem>>, vector<8x1xf32>
    tpu.vector_store %arg8[%c0_17, %c0_18], %24 {strides = array<i32>} : memref<8x1xf32, #tpu.memory_space<vmem>>, vector<8x1xf32>,
    return
  }
  func.func @transform_0(%arg0: i32) -> (i32, i32) {
    %c0_i32 = arith.constant 0 : i32
    %c0_i32_0 = arith.constant 0 : i32
    return %arg0, %c0_i32 : i32, i32
  }
  func.func @transform_1(%arg0: i32) -> (i32, i32) {
    %c0_i32 = arith.constant 0 : i32
    %c0_i32_0 = arith.constant 0 : i32
    %c0_i32_1 = arith.constant 0 : i32
    return %c0_i32, %c0_i32_0 : i32, i32
  }
  func.func @transform_2(%arg0: i32) -> (i32, i32) {
    %c0_i32 = arith.constant 0 : i32
    %c0_i32_0 = arith.constant 0 : i32
    %c0_i32_1 = arith.constant 0 : i32
    return %c0_i32, %c0_i32_0 : i32, i32
  }
  func.func @transform_3(%arg0: i32) -> (i32, i32) {
    %c0_i32 = arith.constant 0 : i32
    %c0_i32_0 = arith.constant 0 : i32
    %c0_i32_1 = arith.constant 0 : i32
    return %c0_i32, %c0_i32_0 : i32, i32
  }
  func.func @transform_4(%arg0: i32) -> (i32, i32) {
    %c0_i32 = arith.constant 0 : i32
    %c0_i32_0 = arith.constant 0 : i32
    %c0_i32_1 = arith.constant 0 : i32
    return %c0_i32, %c0_i32_0 : i32, i32
  }
  func.func @transform_5(%arg0: i32) -> (i32, i32) {
    %c0_i32 = arith.constant 0 : i32
    %c0_i32_0 = arith.constant 0 : i32
    %c0_i32_1 = arith.constant 0 : i32
    return %c0_i32, %c0_i32_0 : i32, i32
  }
  func.func @transform_6(%arg0: i32) -> (i32, i32) {
    %c0_i32 = arith.constant 0 : i32
    %c0_i32_0 = arith.constant 0 : i32
    %c0_i32_1 = arith.constant 0 : i32
    return %c0_i32, %c0_i32_0 : i32, i32
  }
  func.func @transform_7(%arg0: i32) -> (i32, i32) {
    %c0_i32 = arith.constant 0 : i32
    %c0_i32_0 = arith.constant 0 : i32
    return %arg0, %c0_i32 : i32, i32
  }
}

</mosaic_0001>

<bundles_post_ra>
// kernel: tpu_custom_call.1
= control target key start
LH: loop header
LB: loop body
LE: loop exit
PB: predicated region body
PF: predicated region fallthrough
CT: control target
= control target key end

     0   :  { %vm70_vm0 = vcmask 1046528   ;;  %vm71_vm1 = vcmask 1047552   ;;  %v262_v1 = vmov 65535   ;;  %vm66_vm2 = vcmask 515072   ;;  %s357_s1 = inlined_call_operand.vmem [shape: bf16[63,128], index: 1, kind: input, shape index: {}]   ;;  %s358_s3 = inlined_call_operand.vmem [shape: bf16[128,32], index: 3, kind: input, shape index: {}]   ;;  %s359_s2 = inlined_call_operand.vmem [shape: f32[1,128], index: 2, kind: input, shape index: {}]   ;;  %s360_s0 = inlined_call_operand.vmem [shape: f32[8,63], index: 0, kind: input, shape index: {}]   ;;  %s361_s4 = inlined_call_operand.vmem [shape: f32[1,32], index: 4, kind: input, shape index: {}]   ;;  %s362_s5 = inlined_call_operand.vmem [shape: f32[1,32], index: 5, kind: input, shape index: {}]   ;;  %s363_s6 = inlined_call_operand.<no memory space> [shape: f32[1,1], index: 6, kind: input, shape index: {}]   ;;  %s364_s7 = inlined_call_operand.vmem [shape: f32[8,1], index: 7, kind: output, shape index: {}]  }
   0x1   :  { %v248_v0 = vld [vmem:[%s357_s1 + $0x18] sm:$0xff]  ;;  %v72_v2 = vsel %vm70_vm0, 4294967295, %v262_v1  ;;  %v255_v6 = vld [vmem:[%s358_s3 + $0x30] sm:$0xff]  ;;  %v254_v8 = vld [vmem:[%s358_s3 + $0x28] sm:$0xff]  ;;  %v12_v24 = vstv %s363_s6  ;;  %vm181_vm3 = vcmask 261120   ;;  %vm190_vm4 = vcmask 7168  }
   0x2   :  { %v73_v3 = vsel %vm71_vm1, %v72_v2, 0  ;;  %v256_v4 = vld [vmem:[%s358_s3 + $0x38] sm:$0xff]  ;;  %v247_v7 = vld [vmem:[%s357_s1 + $0x10] sm:$0xff]  ;;  %v246_v9 = vld [vmem:[%s357_s1 + $0x8] sm:$0xff]  ;;  %13 = vst [vmem:[#allocation2] sm:$0x1] %v12_v24 }
   0x3   :  { %v75_v5 = vand.u32 %v248_v0, %v73_v3  ;;  %162 = vmatpush.bf16.msra.mxu1 %v256_v4  ;;  %v253_v10 = vld [vmem:[%s358_s3 + $0x20] sm:$0xff]  ;;  %v252_v14 = vld [vmem:[%s358_s3 + $0x18] sm:$0xff]  ;;  %v251_v15 = vld [vmem:[%s358_s3 + $0x10] sm:$0xff] }
   0x4   :  { %v245_v11 = vld [vmem:[%s357_s1] sm:$0xff]  ;;  %v250_v16 = vld [vmem:[%s358_s3 + $0x8] sm:$0xff] }
   0x5   :  { %81 = vmatpush.bf16.msra.mxu0 %v75_v5  ;;  %v29_v12 = vld [vmem:[%s360_s0] sm:$0xff] }
   0x6   :  { %v30_v13 = vpack.c.bf16 %v29_v12, %v29_v12  ;;  %v249_v17 = vld [vmem:[%s358_s3] sm:$0xff] }
   0x7   :  { %163 = vmatpush.bf16.msra.mxu1 %v255_v6  ;;  %v258_v18 = vld [vmem:[%s359_s2] ss:$0 sm:$0xff] }
   0x8   :  { %v259_v25 = vld [vmem:[%s361_s4] ss:$0 sm:$0xff] }
   0x9   :  { %82 = vmatpush.bf16.msra.mxu0 %v247_v7  ;;  %v260_v28 = vld [vmem:[%s362_s5] ss:$0 sm:$0xff] }
   0xa   :  { %v261_v33 = vld [vmem:[#allocation2] ss:$0 sm:$0xff] }
   0xb   :  { %164 = vmatpush.bf16.msra.mxu1 %v254_v8 }
   0xd   :  { %83 = vmatpush.bf16.msra.mxu0 %v246_v9 }
   0xf   :  { %165 = vmatpush.bf16.msra.mxu1 %v253_v10 }
  0x11   :  { %84 = vmatpush.bf16.msra.mxu0 %v245_v11 }
  0x13   :  { %166 = vmatpush.bf16.msra.mxu1 %v252_v14 }
  0x14   :  { %212 = vmatmul.msk.bf16.vlgmr.msra.gmra.mxu0 %vm66_vm2, %v30_v13 }
  0x17   :  { %167 = vmatpush.bf16.msra.mxu1 %v251_v15 }
  0x1b   :  { %168 = vmatpush.bf16.msra.mxu1 %v250_v16 }
  0x1f   :  { %169 = vmatpush.bf16.msra.mxu1 %v249_v17 }
  0x91   :  { %v86_v19 = vpop.f32.mrf.mxu0 }
  0x92   :  { %v87_v20 = vadd.f32 %v258_v18, %v86_v19 }
  0x94   :  { %v92_v21 = vmax.f32 %v87_v20, 0.0 }
  0x96   :  { %v93_v22 = vpack.c.bf16 %v92_v21, %v92_v21 }
  0x98   :  { %170 = vmatmul.bf16.vlgmr.msra.gmra.mxu1 %v93_v22 }
  0x99   :  { %v88_v23 = vpop.f32.mrf.mxu0 }
 0x115   :  { %v171_v26 = vpop.f32.mrf.mxu1 }
 0x116   :  { %v172_v27 = vadd.f32 %v259_v25, %v171_v26 }
 0x118   :  { %v175_v29 = vmax.f32 %v172_v27, 0.0 }
 0x11a   :  { %v180_v30 = vmul.f32 %v260_v28, %v175_v29 }
 0x11c   :  { %v182_v31 = vsel %vm181_vm3, %v180_v30, 0.0 }
 0x11d   :  { %v173_v32 = vpop.f32.mrf.mxu1  ;;  %183 = vadd.xlane.f32.xlu0 %v182_v31 }
 0x190   :  { %v184_v34 = vpop.xlane.xlu0 %183 }
 0x191   :  { %v189_v35 = vadd.f32 %v261_v33, %v184_v34 }
 0x193   :  { %191 = vst.msk [vmem:[%s364_s7] sm:$0xff] %vm190_vm4, %v189_v35 }

</bundles_post_ra>
